<compile_context>
chip_gen: v6e
topology: v6e:2x2x1
jax: 0.10.0
libtpu: 0.0.40
codegen_flags: <defaults>
</compile_context>

<pallas_src>
import functools

import jax
import jax.numpy as jnp
from jax.experimental import pallas as pl
from jax.experimental.pallas import tpu as pltpu


def _label_smoothing_kernel(out_ref, tgt_ref, loss_ref, *, eps, num_classes,
                            ignore_index):
    logits = out_ref[...].astype(jnp.float32)             # (TB, C) f32 math
    tgt = tgt_ref[...]                                     # (TB, 1) int32

    # non_pad_mask = target.ne(ignore_index).float()
    non_pad = (tgt != ignore_index).astype(jnp.float32)    # (TB, 1)
    # target[target.eq(ignore_index)] = 0
    tgt_clamped = jnp.where(tgt == ignore_index, 0, tgt)   # (TB, 1)

    # Numerically stable log-softmax pieces. No (TB, C) log_prb / one-hot /
    # smoothed tensors are materialized; only `shifted` and its reductions.
    row_max = jnp.max(logits, axis=-1, keepdims=True)                  # (TB, 1)
    shifted = logits - row_max                                         # (TB, C)
    lse = jnp.log(jnp.sum(jnp.exp(shifted), axis=-1, keepdims=True))   # (TB, 1)
    sum_shifted = jnp.sum(shifted, axis=-1, keepdims=True)             # (TB, 1)

    # shifted[target] via iota compare + masked reduce (stays on the VPU).
    class_ids = jax.lax.broadcasted_iota(jnp.int32, shifted.shape, 1)  # (TB, C)
    shifted_at_tgt = jnp.sum(
        jnp.where(class_ids == tgt_clamped, shifted, 0.0),
        axis=-1, keepdims=True)                                        # (TB, 1)

    # smoothed = eps/C + one_hot * (1 - eps - eps/C)
    uniform_w = eps / num_classes
    target_w = 1.0 - eps - uniform_w
    # loss = -sum(smoothed * log_prb)
    #      = -[ uniform_w * (sum(shifted) - C*lse) + target_w * (shifted[t] - lse) ]
    loss = -(uniform_w * (sum_shifted - num_classes * lse)
             + target_w * (shifted_at_tgt - lse))                      # (TB, 1)

    loss_ref[...] = (loss * non_pad).astype(loss_ref.dtype)


def _choose_batch_tile(batch, num_classes, in_itemsize,
                       vmem_budget_bytes=36 * 1024 * 1024):
    """Largest multiple-of-8 batch tile whose pipeline fits the VMEM budget."""
    # Per batch-row footprint:
    #   2 double-buffered logits tiles (input dtype)
    #   ~3 f32 (tb, C) working temporaries inside the kernel body
    #   lane-padded (tb, 128) target + loss tiles, double-buffered
    per_row = num_classes * (2 * in_itemsize + 3 * 4) + 4 * 128 * 4
    tb = vmem_budget_bytes // per_row
    tb = int(max(8, min(1024, (tb // 8) * 8)))
    # No point tiling deeper than the (8-rounded) batch itself.
    batch_r8 = ((batch + 7) // 8) * 8
    return min(tb, batch_r8), per_row


def label_smoothing_loss(output, target, *, label_smoothing, tgt_vocab_size,
                         ignore_index=-100):
    """output: (B, C) float; target: (B,) int. Returns per-example loss (B,)."""
    assert 0.0 < label_smoothing <= 1.0
    B, C = output.shape
    assert C == tgt_vocab_size

    in_itemsize = jnp.dtype(output.dtype).itemsize
    tb, per_row = _choose_batch_tile(B, C, in_itemsize)

    # Pad the batch so it divides the tile; padded rows use ignore_index so
    # their loss is exactly 0 and is sliced off afterwards.
    B_pad = ((B + tb - 1) // tb) * tb
    target2d = target.astype(jnp.int32).reshape(B, 1)
    if B_pad != B:
        output = jnp.pad(output, ((0, B_pad - B), (0, 0)))
        target2d = jnp.pad(target2d, ((0, B_pad - B), (0, 0)),
                           constant_values=ignore_index)

    kernel = functools.partial(
        _label_smoothing_kernel,
        eps=float(label_smoothing),
        num_classes=int(tgt_vocab_size),
        ignore_index=int(ignore_index),
    )

    # Raise the scoped-VMEM limit above the estimated pipeline footprint
    # (v5e defaults to 16 MiB) while staying under v7x's 64 MiB physical VMEM.
    vmem_need = tb * per_row
    vmem_limit = int(min(48 * 1024 * 1024,
                         max(2 * vmem_need, 32 * 1024 * 1024)))

    cost = pl.CostEstimate(
        flops=5 * B_pad * C,
        transcendentals=B_pad * C,
        bytes_accessed=B_pad * C * in_itemsize + 2 * B_pad * 4,
    )

    loss2d = pl.pallas_call(
        kernel,
        out_shape=jax.ShapeDtypeStruct((B_pad, 1), jnp.float32),
        grid_spec=pltpu.PrefetchScalarGridSpec(
            num_scalar_prefetch=0,
            grid=(B_pad // tb,),
            in_specs=[
                pl.BlockSpec((tb, C), lambda i: (i, 0)),
                pl.BlockSpec((tb, 1), lambda i: (i, 0)),
            ],
            out_specs=pl.BlockSpec((tb, 1), lambda i: (i, 0)),
        ),
        compiler_params=pltpu.CompilerParams(
            dimension_semantics=("parallel",),
            vmem_limit_bytes=vmem_limit,
        ),
        cost_estimate=cost,
    )(output, target2d)

    return loss2d.reshape(B_pad)[:B]


def _reference(output, target, *, eps, num_classes, ignore_index=-100):
    non_pad = (target != ignore_index).astype(jnp.float32)
    tgt = jnp.where(target == ignore_index, 0, target)
    one_hot = jax.nn.one_hot(tgt, num_classes, dtype=jnp.float32)
    one_hot = one_hot * (1 - eps) + (1 - one_hot) * eps / num_classes
    log_prb = jax.nn.log_softmax(output.astype(jnp.float32), axis=-1)
    return -(one_hot * log_prb).sum(-1) * non_pad


if __name__ == "__main__":
    B, C = 8, 128
    label_smoothing = 0.1
    ignore_index = -100

    key = jax.random.PRNGKey(0)
    k1, k2, k3 = jax.random.split(key, 3)
    output = jax.random.normal(k1, (B, C), dtype=jnp.float32)
    target = jax.random.randint(k2, (B,), 0, C, dtype=jnp.int32)
    # Mark a couple of entries as padding (ignore_index).
    pad_mask = jax.random.bernoulli(k3, 0.25, (B,))
    target = jnp.where(pad_mask, ignore_index, target)

    loss = label_smoothing_loss(
        output, target,
        label_smoothing=label_smoothing,
        tgt_vocab_size=C,
        ignore_index=ignore_index,
    )
    loss = jax.block_until_ready(loss)

    ref = _reference(output, target, eps=label_smoothing, num_classes=C,
                     ignore_index=ignore_index)
    assert loss.shape == (B,)
    assert jnp.allclose(loss, ref, atol=1e-5, rtol=1e-5), (loss, ref)

    print("KERNEL_OK")
</pallas_src>

<mosaic_0001>
module attributes {stable_mosaic.version = 11 : i64} {
  func.func @_label_smoothing_kernel(%arg0: i32, %arg1: memref<8x128xf32, #tpu.memory_space<vmem>>, %arg2: memref<8x1xi32, #tpu.memory_space<vmem>>, %arg3: memref<8x1xf32, #tpu.memory_space<vmem>>) attributes {dimension_semantics = [#tpu.dimension_semantics<parallel>], iteration_bounds = array<i64: 1>, scalar_prefetch = 0 : i64, scratch_operands = 0 : i64, tpu.core_type = #tpu.core_type<tc>, window_params = [{transform_indices = @transform_0, window_bounds = array<i64: 8, 128>}, {transform_indices = @transform_1, window_bounds = array<i64: 8, 1>}, {transform_indices = @transform_2, window_bounds = array<i64: 8, 1>}]} {
    %c0 = arith.constant 0 : index
    %c0_0 = arith.constant 0 : index
    %0 = vector.load %arg1[%c0, %c0_0] : memref<8x128xf32, #tpu.memory_space<vmem>>, vector<8x128xf32>
    %c0_1 = arith.constant 0 : index
    %c0_2 = arith.constant 0 : index
    %1 = vector.load %arg2[%c0_1, %c0_2] : memref<8x1xi32, #tpu.memory_space<vmem>>, vector<8x1xi32>
    %c-100_i32 = arith.constant -100 : i32
    %2 = vector.broadcast %c-100_i32 : i32 to vector<8x1xi32>
    %3 = arith.cmpi ne, %1, %2 : vector<8x1xi32>
    %4 = arith.extui %3 : vector<8x1xi1> to vector<8x1xi32>
    %5 = arith.sitofp %4 : vector<8x1xi32> to vector<8x1xf32>
    %c-100_i32_3 = arith.constant -100 : i32
    %6 = vector.broadcast %c-100_i32_3 : i32 to vector<8x1xi32>
    %7 = arith.cmpi eq, %1, %6 : vector<8x1xi32>
    %c0_i32 = arith.constant 0 : i32
    %8 = vector.broadcast %c0_i32 : i32 to vector<8x1xi32>
    %9 = arith.select %7, %8, %1 : vector<8x1xi1>, vector<8x1xi32>
    %cst = arith.constant dense<0xFF800000> : vector<8xf32>
    %10 = vector.multi_reduction <maximumf>, %0, %cst [1] : vector<8x128xf32> to vector<8xf32>
    %11 = vector.shape_cast %10 : vector<8xf32> to vector<8x1xf32>
    %12 = vector.broadcast %11 : vector<8x1xf32> to vector<8x128xf32>
    %13 = arith.subf %0, %12 : vector<8x128xf32>
    %14 = math.exp %13 : vector<8x128xf32>
    %cst_4 = arith.constant dense<0.000000e+00> : vector<8xf32>
    %15 = vector.multi_reduction <add>, %14, %cst_4 [1] : vector<8x128xf32> to vector<8xf32>
    %16 = vector.shape_cast %15 : vector<8xf32> to vector<8x1xf32>
    %17 = math.log %16 : vector<8x1xf32>
    %cst_5 = arith.constant dense<0.000000e+00> : vector<8xf32>
    %18 = vector.multi_reduction <add>, %13, %cst_5 [1] : vector<8x128xf32> to vector<8xf32>
    %19 = vector.shape_cast %18 : vector<8xf32> to vector<8x1xf32>
    %20 = tpu.iota {dimensions = array<i32: 1>} : vector<8x128xi32>
    %21 = vector.broadcast %9 : vector<8x1xi32> to vector<8x128xi32>
    %22 = arith.cmpi eq, %20, %21 : vector<8x128xi32>
    %cst_6 = arith.constant 0.000000e+00 : f32
    %23 = vector.broadcast %cst_6 : f32 to vector<8x128xf32>
    %24 = arith.select %22, %13, %23 : vector<8x128xi1>, vector<8x128xf32>
    %cst_7 = arith.constant dense<0.000000e+00> : vector<8xf32>
    %25 = vector.multi_reduction <add>, %24, %cst_7 [1] : vector<8x128xf32> to vector<8xf32>
    %26 = vector.shape_cast %25 : vector<8xf32> to vector<8x1xf32>
    %cst_8 = arith.constant 1.280000e+02 : f32
    %27 = vector.broadcast %cst_8 : f32 to vector<8x1xf32>
    %28 = arith.mulf %27, %17 : vector<8x1xf32>
    %29 = arith.subf %19, %28 : vector<8x1xf32>
    %cst_9 = arith.constant 7.812500e-04 : f32
    %30 = vector.broadcast %cst_9 : f32 to vector<8x1xf32>
    %31 = arith.mulf %30, %29 : vector<8x1xf32>
    %32 = arith.subf %26, %17 : vector<8x1xf32>
    %cst_10 = arith.constant 0.899218738 : f32
    %33 = vector.broadcast %cst_10 : f32 to vector<8x1xf32>
    %34 = arith.mulf %33, %32 : vector<8x1xf32>
    %35 = arith.addf %31, %34 : vector<8x1xf32>
    %cst_11 = arith.constant 0.000000e+00 : f32
    %36 = vector.broadcast %cst_11 : f32 to vector<8x1xf32>
    %37 = arith.subf %36, %35 : vector<8x1xf32>
    %38 = arith.mulf %37, %5 : vector<8x1xf32>
    %c0_12 = arith.constant 0 : index
    %c0_13 = arith.constant 0 : index
    %39 = vector.load %arg3[%c0_12, %c0_13] : memref<8x1xf32, #tpu.memory_space<vmem>>, vector<8x1xf32>
    tpu.vector_store %arg3[%c0_12, %c0_13], %38 {strides = array<i32>} : memref<8x1xf32, #tpu.memory_space<vmem>>, vector<8x1xf32>,
    return
  }
  func.func @transform_0(%arg0: i32) -> (i32, i32) {
    %c0_i32 = arith.constant 0 : i32
    %c0_i32_0 = arith.constant 0 : i32
    return %arg0, %c0_i32 : i32, i32
  }
  func.func @transform_1(%arg0: i32) -> (i32, i32) {
    %c0_i32 = arith.constant 0 : i32
    %c0_i32_0 = arith.constant 0 : i32
    return %arg0, %c0_i32 : i32, i32
  }
  func.func @transform_2(%arg0: i32) -> (i32, i32) {
    %c0_i32 = arith.constant 0 : i32
    %c0_i32_0 = arith.constant 0 : i32
    return %arg0, %c0_i32 : i32, i32
  }
}

</mosaic_0001>

<bundles_post_ra>
// kernel: tpu_custom_call.1
= control target key start
LH: loop header
LB: loop body
LE: loop exit
PB: predicated region body
PF: predicated region fallthrough
CT: control target
= control target key end

     0   :  { %v60_v1 = vmov 0   ;;  %v29_v7 = vlaneseq  ;;  %v61_v23 = vmov 0.0   ;;  %vm46_vm3 = vcmask 7168   ;;  %s86_s0 = inlined_call_operand.vmem [shape: f32[8,128], index: 0, kind: input, shape index: {}]   ;;  %s87_s1 = inlined_call_operand.vmem [shape: s32[8,1], index: 1, kind: input, shape index: {}]   ;;  %s88_s2 = inlined_call_operand.vmem [shape: f32[8,1], index: 2, kind: output, shape index: {}]  }
   0x1   :  { %v11_v0 = vld [vmem:[%s86_s0] sm:$0xff]  ;;  %55 = vset.pattern.permute.xlu0 %v60_v1 }
   0x2   :  { %18 = vmax.xlane.f32.xlu0 %v11_v0  ;;  %v12_v2 = vld [vmem:[%s87_s1] sm:$0xff]  ;;  %v30_v9 = vand.u32 127, %v29_v7 }
   0x3   :  { %vm16_vm0 = vcmp.eq.s32.totalorder %v12_v2, 4294967196  ;;  %vm13_vm2 = vcmp.ne.s32.totalorder %v12_v2, 4294967196 }
   0x4   :  { %v17_v3 = vsel %vm16_vm0, 0, %v12_v2  ;;  %v52_v24 = vsel %vm13_vm2, 1.0, %v61_v23 }
  0x18   :  { %32 = vperm.xlu0 %55, %v17_v3  }
  0x8b   :  { %v19_v4 = vpop.xlane.xlu0 %18 }
  0x8c   :  { %v20_v5 = vsub.f32 %v11_v0, %v19_v4 }
  0x8e   :  { %v21_v6 = vmul.f32 1.442695, %v20_v5 }
  0x90   :  { %56 = vpow2.f32 %v21_v6 }
  0x93   :  { %v33_v10 = vpop.permute.xlu0 %32 }
  0x94   :  { %vm34_vm1 = vcmp.eq.s32.totalorder %v30_v9, %v33_v10 }
  0x95   :  { %v35_v11 = vsel %vm34_vm1, %v20_v5, 0.0 }
  0x9d   :  { %v57_v8 = vpop.eup %56 }
  0x9e   :  { %23 = vadd.xlane.f32.xlu1 %v57_v8 }
  0xa2   :  { %27 = vadd.xlane.f32.xlu1 %v20_v5 }
  0xa6   :  { %36 = vadd.xlane.f32.xlu1 %v35_v11 }
 0x127   :  { %v24_v12 = vpop.xlane.xlu1 %23 }
 0x128   :  { %58 = vlog2.f32 %v24_v12 }
 0x12b   :  { %v28_v13 = vpop.xlane.xlu1 %27 }
 0x12f   :  { %v37_v16 = vpop.xlane.xlu1 %36 }
 0x135   :  { %v59_v14 = vpop.eup %58 }
 0x136   :  { %v26_v15 = vmul.f32 0.6931472, %v59_v14 }
 0x138   :  { %v38_v17 = vmul.f32 128.0, %v26_v15  ;;  %v41_v18 = vsub.f32 %v37_v16, %v26_v15 }
 0x13a   :  { %v39_v19 = vsub.f32 %v28_v13, %v38_v17  ;;  %v42_v21 = vmul.f32 0.89921874, %v41_v18 }
 0x13c   :  { %v40_v20 = vmul.f32 0.00078125, %v39_v19 }
 0x13e   :  { %v43_v22 = vadd.f32 %v42_v21, %v40_v20 }
 0x140   :  { %v44_v25 = vsub.f32 0.0, %v43_v22 }
 0x142   :  { %v45_v26 = vmul.f32 %v52_v24, %v44_v25 }
 0x144   :  { %47 = vst.msk [vmem:[%s88_s2] sm:$0xff] %vm46_vm3, %v45_v26 }

</bundles_post_ra>
